<compile_context>
chip_gen: v5e
topology: v5e:2x2
jax: 0.10.0
libtpu: 0.0.40
codegen_flags: <defaults>
</compile_context>

<pallas_src>
import functools

import numpy as np
import jax
import jax.numpy as jnp
from jax.experimental import pallas as pl
from jax.experimental.pallas import tpu as pltpu


def _round_up(x: int, m: int) -> int:
    return ((x + m - 1) // m) * m


def _make_head_kernel(no_imgnorm: bool, use_abs: bool):
    """Builds the fused l2norm -> fc -> l2norm -> abs kernel for one row tile."""

    def kernel(x_ref, w_ref, b_ref, o_ref):
        # x_ref: [TM, K]   w_ref: [K, N] (bf16, W^T)   b_ref: [1, N]   o_ref: [TM, N]
        x = x_ref[...].astype(jnp.float32)

        # l2norm of CNN features (row-wise); rsqrt lowers to the EUP slot.
        xn = x * jax.lax.rsqrt(jnp.sum(x * x, axis=-1, keepdims=True))

        # Linear layer on the MXU: bf16 inputs, f32 accumulation.
        feats = jnp.dot(xn.astype(jnp.bfloat16), w_ref[...],
                        preferred_element_type=jnp.float32) + b_ref[...]

        if not no_imgnorm:
            feats = feats * jax.lax.rsqrt(
                jnp.sum(feats * feats, axis=-1, keepdims=True))
        if use_abs:
            feats = jnp.abs(feats)

        o_ref[...] = feats.astype(o_ref.dtype)

    return kernel


def prepare_fc_params(weight, bias):
    """Hoist the weight transpose + bf16 cast out of the per-call hot path.

    weight: [embed_size, in_features] (PyTorch layout), bias: [embed_size].
    Returns (w_t [in_features, embed] bf16, bias [1, embed] f32).
    """
    w_t = jnp.asarray(weight).T.astype(jnp.bfloat16)
    b2d = jnp.asarray(bias, dtype=jnp.float32).reshape(1, -1)
    return w_t, b2d


@functools.partial(jax.jit,
                   static_argnames=("use_abs", "no_imgnorm", "block_m"))
def encoder_image_full_head(cnn_features, w_t, bias2d, *,
                            use_abs=False, no_imgnorm=False, block_m=256):
    """Post-CNN head of EncoderImageFull.

    cnn_features: [..., in_features] CNN feature vectors.
    w_t:          [in_features, embed_size] (pre-transposed, bf16).
    bias2d:       [1, embed_size] (f32).
    """
    orig_shape = cnn_features.shape
    k_dim = orig_shape[-1]
    n_dim = w_t.shape[1]

    x2d = cnn_features.reshape(-1, k_dim)
    m = x2d.shape[0]

    # Row tile: multiple of 8 (f32 sublanes); pad M so the tile divides it.
    tm = min(block_m, _round_up(m, 8))
    m_pad = _round_up(m, tm)
    if m_pad != m:
        x2d = jnp.pad(x2d, ((0, m_pad - m), (0, 0)))

    grid = (m_pad // tm,)

    out2d = pl.pallas_call(
        _make_head_kernel(no_imgnorm, use_abs),
        out_shape=jax.ShapeDtypeStruct((m_pad, n_dim), jnp.float32),
        grid=grid,
        in_specs=[
            pl.BlockSpec((tm, k_dim), lambda i: (i, 0)),    # X: marches over rows
            pl.BlockSpec((k_dim, n_dim), lambda i: (0, 0)),  # W^T: resident
            pl.BlockSpec((1, n_dim), lambda i: (0, 0)),      # bias: resident
        ],
        out_specs=pl.BlockSpec((tm, n_dim), lambda i: (i, 0)),
        compiler_params=pltpu.CompilerParams(
            dimension_semantics=("parallel",),
            # Above the 32 MiB scoped default; actual use (2x X tile + W +
            # 2x out tile) stays well under the 64 MiB v7x physical VMEM.
            vmem_limit_bytes=64 * 1024 * 1024,
        ),
    )(x2d, w_t, bias2d)

    out = out2d[:m]
    return out.reshape(orig_shape[:-1] + (n_dim,))


def init_params(key, in_features, embed_size):
    """Xavier-uniform init matching EncoderImageFull.init_weights."""
    r = np.sqrt(6.0) / np.sqrt(in_features + embed_size)
    weight = jax.random.uniform(key, (embed_size, in_features),
                                minval=-r, maxval=r, dtype=jnp.float32)
    bias = jnp.zeros((embed_size,), dtype=jnp.float32)
    return weight, bias


if __name__ == "__main__":
    key = jax.random.PRNGKey(0)
    k_x, k_w = jax.random.split(key)

    # Small shapes: stand-in CNN feature vectors (the VGG19 backbone output
    # would be [batch, 4096] at production scale).
    batch, in_features, embed_size = 6, 256, 128
    cnn_feats = jax.random.normal(k_x, (batch, in_features), dtype=jnp.float32)
    weight, bias = init_params(k_w, in_features, embed_size)

    # Transpose + bf16 cast done once, outside the hot path.
    w_t, b2d = prepare_fc_params(weight, bias)

    out = encoder_image_full_head(cnn_feats, w_t, b2d)
    out = jax.block_until_ready(out)

    # Reference in plain JAX (f32 end-to-end); kernel uses bf16 on the MXU so
    # compare with a bf16-appropriate tolerance.
    xn = cnn_feats / jnp.sqrt(jnp.sum(cnn_feats * cnn_feats, -1, keepdims=True))
    ref = xn @ weight.T + bias
    ref = ref / jnp.sqrt(jnp.sum(ref * ref, -1, keepdims=True))
    np.testing.assert_allclose(np.asarray(out), np.asarray(ref),
                               rtol=3e-2, atol=3e-2)

    assert out.shape == (batch, embed_size)
    print("KERNEL_OK")
</pallas_src>

<mosaic_0001>
module attributes {stable_mosaic.version = 11 : i64} {
  func.func @kernel(%arg0: i32, %arg1: memref<8x256xf32, #tpu.memory_space<vmem>>, %arg2: memref<256x128xbf16, #tpu.memory_space<vmem>>, %arg3: memref<1x128xf32, #tpu.memory_space<vmem>>, %arg4: memref<8x128xf32, #tpu.memory_space<vmem>>) attributes {dimension_semantics = [#tpu.dimension_semantics<parallel>], iteration_bounds = array<i64: 1>, scalar_prefetch = 0 : i64, scratch_operands = 0 : i64, tpu.core_type = #tpu.core_type<tc>, window_params = [{transform_indices = @transform_0, window_bounds = array<i64: 8, 256>}, {pipeline_mode = #tpu.pipeline_mode<synchronous>, transform_indices = @transform_1, window_bounds = array<i64: 256, 128>}, {pipeline_mode = #tpu.pipeline_mode<synchronous>, transform_indices = @transform_2, window_bounds = array<i64: 1, 128>}, {transform_indices = @transform_3, window_bounds = array<i64: 8, 128>}]} {
    %c0 = arith.constant 0 : index
    %c0_0 = arith.constant 0 : index
    %0 = vector.load %arg1[%c0, %c0_0] : memref<8x256xf32, #tpu.memory_space<vmem>>, vector<8x256xf32>
    %1 = arith.mulf %0, %0 : vector<8x256xf32>
    %cst = arith.constant dense<0.000000e+00> : vector<8xf32>
    %2 = vector.multi_reduction <add>, %1, %cst [1] : vector<8x256xf32> to vector<8xf32>
    %3 = vector.shape_cast %2 : vector<8xf32> to vector<8x1xf32>
    %4 = math.rsqrt %3 : vector<8x1xf32>
    %5 = vector.broadcast %4 : vector<8x1xf32> to vector<8x256xf32>
    %6 = arith.mulf %0, %5 : vector<8x256xf32>
    %7 = arith.truncf %6 : vector<8x256xf32> to vector<8x256xbf16>
    %c0_1 = arith.constant 0 : index
    %c0_2 = arith.constant 0 : index
    %8 = vector.load %arg2[%c0_1, %c0_2] : memref<256x128xbf16, #tpu.memory_space<vmem>>, vector<256x128xbf16>
    %cst_3 = arith.constant dense<0.000000e+00> : vector<8x128xf32>
    %9 = tpu.matmul %7, %8, %cst_3 {dimension_numbers = #tpu.dot_dimension_numbers<[1], [0], [0], [1], [0, 0, 1, 1], [], []>} : vector<8x256xbf16>, vector<256x128xbf16>, vector<8x128xf32> -> vector<8x128xf32>
    %c0_4 = arith.constant 0 : index
    %c0_5 = arith.constant 0 : index
    %10 = vector.load %arg3[%c0_4, %c0_5] : memref<1x128xf32, #tpu.memory_space<vmem>>, vector<1x128xf32>
    %11 = vector.broadcast %10 : vector<1x128xf32> to vector<8x128xf32>
    %12 = arith.addf %9, %11 : vector<8x128xf32>
    %13 = arith.mulf %12, %12 : vector<8x128xf32>
    %cst_6 = arith.constant dense<0.000000e+00> : vector<8xf32>
    %14 = vector.multi_reduction <add>, %13, %cst_6 [1] : vector<8x128xf32> to vector<8xf32>
    %15 = vector.shape_cast %14 : vector<8xf32> to vector<8x1xf32>
    %16 = math.rsqrt %15 : vector<8x1xf32>
    %17 = vector.broadcast %16 : vector<8x1xf32> to vector<8x128xf32>
    %18 = arith.mulf %12, %17 : vector<8x128xf32>
    %c0_7 = arith.constant 0 : index
    %c0_8 = arith.constant 0 : index
    %19 = vector.load %arg4[%c0_7, %c0_8] : memref<8x128xf32, #tpu.memory_space<vmem>>, vector<8x128xf32>
    tpu.vector_store %arg4[%c0_7, %c0_8], %18 {strides = array<i32>} : memref<8x128xf32, #tpu.memory_space<vmem>>, vector<8x128xf32>,
    return
  }
  func.func @transform_0(%arg0: i32) -> (i32, i32) {
    %c0_i32 = arith.constant 0 : i32
    %c0_i32_0 = arith.constant 0 : i32
    return %arg0, %c0_i32 : i32, i32
  }
  func.func @transform_1(%arg0: i32) -> (i32, i32) {
    %c0_i32 = arith.constant 0 : i32
    %c0_i32_0 = arith.constant 0 : i32
    %c0_i32_1 = arith.constant 0 : i32
    return %c0_i32, %c0_i32_0 : i32, i32
  }
  func.func @transform_2(%arg0: i32) -> (i32, i32) {
    %c0_i32 = arith.constant 0 : i32
    %c0_i32_0 = arith.constant 0 : i32
    %c0_i32_1 = arith.constant 0 : i32
    return %c0_i32, %c0_i32_0 : i32, i32
  }
  func.func @transform_3(%arg0: i32) -> (i32, i32) {
    %c0_i32 = arith.constant 0 : i32
    %c0_i32_0 = arith.constant 0 : i32
    return %arg0, %c0_i32 : i32, i32
  }
}

</mosaic_0001>

<bundles_post_ra>
// kernel: encoder_image_full_head.1
= control target key start
LH: loop header
LB: loop body
LE: loop exit
PB: predicated region body
PF: predicated region fallthrough
CT: control target
= control target key end

     0   :  { %8 = vsyncpa [#allocation3], 0  ;;  %s422_s0 = inlined_call_operand.vmem [shape: f32[8,256], index: 0, kind: input, shape index: {}]   ;;  %s423_s1 = inlined_call_operand.hbm [shape: bf16[256,128], index: 1, kind: input, shape index: {}]   ;;  %s424_s2 = inlined_call_operand.vmem [shape: f32[1,128], index: 2, kind: input, shape index: {}]   ;;  %s425_s3 = inlined_call_operand.hbm [shape: f32[8,128], index: 3, kind: output, shape index: {}]  }
   0x1   :  { %9 = vsyncpa [#allocation4], 0  ;;  %s16_s14 = sshll.u32 %s423_s1, 4  ;;  %s383_s15 = smov [#allocation2]   ;;  %s17_s14 = int_to_ptr.hbm [resolvable:$true] %s16_s14 }
   0x2   :  { %s18_s16 = sshll.u32 %s383_s15, 4  ;;  %s384_s17 = smov 64   ;;  %s19_s16 = int_to_ptr.vmem [resolvable:$true] %s18_s16 }
   0x3   :  { %s385_s18 = smov 4  }
   0x4   :  { %24 = dma.hbm_to_vmem [thread:$0]  %s17_s14, 2048, %s19_s16, [#allocation3], %s384_s17, %s384_s17, %s385_s18  }
   0x5   :  { %379 = dma.done.wait [#allocation3], 2048  }
   0x6   :  { %380 = vsyncadd [#allocation3], 4294965248  ;;  %v31_v0 = vld [vmem:[%s422_s0] sm:$0xff]  ;;  %v32_v1 = vld [vmem:[%s422_s0 + $0x8] sm:$0xff]  ;;  %s386_s23 = smov [#allocation5]   ;;  %s232_s26 = sshll.u32 %s425_s3, 4  ;;  %s233_s26 = int_to_ptr.hbm [resolvable:$true] %s232_s26 }
   0x7   :  { %v313_v2 = vld [vmem:[#allocation2 + $0x38] sm:$0xff]  ;;  %v33_v3 = vmul.f32 %v31_v0, %v31_v0  ;;  %v34_v4 = vmul.f32 %v32_v1, %v32_v1  ;;  %v312_v6 = vld [vmem:[#allocation2 + $0x30] sm:$0xff]  ;;  %v311_v9 = vld [vmem:[#allocation2 + $0x28] sm:$0xff] }
   0x8   :  { %v321_v5 = vld [vmem:[#allocation2 + $0x78] sm:$0xff]  ;;  %184 = vmatpush.bf16.msra.mxu0 %v313_v2  ;;  %v320_v8 = vld [vmem:[#allocation2 + $0x70] sm:$0xff]  ;;  %v319_v10 = vld [vmem:[#allocation2 + $0x68] sm:$0xff] }
   0x9   :  { %v35_v7 = vadd.f32 %v34_v4, %v33_v3  ;;  %197 = vmatpush.bf16.msra.mxu1 %v321_v5  ;;  %v310_v11 = vld [vmem:[#allocation2 + $0x20] sm:$0xff]  ;;  %v309_v13 = vld [vmem:[#allocation2 + $0x18] sm:$0xff]  ;;  %v308_v15 = vld [vmem:[#allocation2 + $0x10] sm:$0xff] }
   0xa   :  { %v318_v12 = vld [vmem:[#allocation2 + $0x60] sm:$0xff]  ;;  %v317_v14 = vld [vmem:[#allocation2 + $0x58] sm:$0xff]  ;;  %v316_v16 = vld [vmem:[#allocation2 + $0x50] sm:$0xff] }
   0xb   :  { %36 = vadd.xlane.f32.xlu0 %v35_v7  ;;  %v307_v17 = vld [vmem:[#allocation2 + $0x8] sm:$0xff]  ;;  %v306_v19 = vld [vmem:[#allocation2] sm:$0xff] }
   0xc   :  { %185 = vmatpush.bf16.msra.mxu0 %v312_v6  ;;  %v315_v18 = vld [vmem:[#allocation2 + $0x48] sm:$0xff]  ;;  %v314_v20 = vld [vmem:[#allocation2 + $0x40] sm:$0xff] }
   0xd   :  { %198 = vmatpush.bf16.msra.mxu1 %v320_v8  ;;  %v326_v33 = vld [vmem:[%s424_s2] ss:$0 sm:$0xff]  ;;  %s230_s2 = sshll.u32 %s386_s23, 4  ;;  %s231_s2 = int_to_ptr.vmem [resolvable:$true] %s230_s2 }
  0x10   :  { %186 = vmatpush.bf16.msra.mxu0 %v311_v9 }
  0x11   :  { %199 = vmatpush.bf16.msra.mxu1 %v319_v10 }
  0x14   :  { %187 = vmatpush.bf16.msra.mxu0 %v310_v11 }
  0x15   :  { %200 = vmatpush.bf16.msra.mxu1 %v318_v12 }
  0x18   :  { %188 = vmatpush.bf16.msra.mxu0 %v309_v13 }
  0x19   :  { %201 = vmatpush.bf16.msra.mxu1 %v317_v14 }
  0x1c   :  { %189 = vmatpush.bf16.msra.mxu0 %v308_v15 }
  0x1d   :  { %202 = vmatpush.bf16.msra.mxu1 %v316_v16 }
  0x20   :  { %190 = vmatpush.bf16.msra.mxu0 %v307_v17 }
  0x21   :  { %203 = vmatpush.bf16.msra.mxu1 %v315_v18 }
  0x24   :  { %191 = vmatpush.bf16.msra.mxu0 %v306_v19 }
  0x25   :  { %204 = vmatpush.bf16.msra.mxu1 %v314_v20 }
  0x7e   :  { %v37_v21 = vpop.xlane.xlu0 %36 }
  0x7f   :  { %327 = vrsqrt.f32 %v37_v21  ;;  %vm44_vm1 = vweird.f32 %v37_v21 }
  0x85   :  { %v328_v22 = vpop.eup %327 }
  0x86   :  { %v39_v23 = vmul.f32 %v328_v22, %v37_v21  ;;  %vm45_vm0 = vweird.f32 %v328_v22 }
  0x87   :  { %vm46_vm2 = vmor %vm44_vm1, %vm45_vm0 }
  0x88   :  { %v40_v24 = vmul.f32 %v328_v22, %v39_v23 }
  0x8a   :  { %v41_v25 = vmul.f32 0.5, %v40_v24 }
  0x8c   :  { %v42_v26 = vsub.f32 1.5, %v41_v25 }
  0x8e   :  { %v43_v27 = vmul.f32 %v328_v22, %v42_v26 }
  0x90   :  { %v47_v28 = vsel %vm46_vm2, %v328_v22, %v43_v27 }
  0x91   :  { %v48_v29 = vmul.f32 %v47_v28, %v31_v0  ;;  %v49_v30 = vmul.f32 %v47_v28, %v32_v1 }
  0x93   :  { %v50_v31 = vpack.c.bf16 %v48_v29, %v48_v29  ;;  %v51_v32 = vpack.c.bf16 %v49_v30, %v49_v30 }
  0x95   :  { %192 = vmatmul.bf16.vlgmr.msra.gmra.mxu0 %v50_v31  ;;  %205 = vmatmul.bf16.vlgmr.msra.gmra.mxu1 %v51_v32 }
 0x112   :  { %v193_v34 = vpop.f32.mrf.mxu0  ;;  %v206_v35 = vpop.f32.mrf.mxu1 }
 0x113   :  { %v194_v36 = vadd.f32 %v326_v33, %v193_v34 }
 0x115   :  { %v207_v37 = vadd.f32 %v206_v35, %v194_v36 }
 0x117   :  { %v210_v38 = vmul.f32 %v207_v37, %v207_v37 }
 0x119   :  { %211 = vadd.xlane.f32.xlu0 %v210_v38 }
 0x11a   :  { %v195_v39 = vpop.f32.mrf.mxu0  ;;  %v208_v40 = vpop.f32.mrf.mxu1 }
 0x18c   :  { %v212_v41 = vpop.xlane.xlu0 %211 }
 0x18d   :  { %329 = vrsqrt.f32 %v212_v41  ;;  %vm219_vm4 = vweird.f32 %v212_v41 }
 0x193   :  { %v330_v42 = vpop.eup %329 }
 0x194   :  { %v214_v43 = vmul.f32 %v330_v42, %v212_v41  ;;  %vm220_vm3 = vweird.f32 %v330_v42 }
 0x195   :  { %vm221_vm5 = vmor %vm219_vm4, %vm220_vm3 }
 0x196   :  { %v215_v44 = vmul.f32 %v330_v42, %v214_v43 }
 0x198   :  { %v216_v45 = vmul.f32 0.5, %v215_v44 }
 0x19a   :  { %v217_v46 = vsub.f32 1.5, %v216_v45 }
 0x19c   :  { %v218_v47 = vmul.f32 %v330_v42, %v217_v46 }
 0x19e   :  { %v222_v48 = vsel %vm221_vm5, %v330_v42, %v218_v47 }
 0x19f   :  { %v223_v49 = vmul.f32 %v222_v48, %v207_v37 }
 0x1a1   :  { %224 = vst [vmem:[#allocation5] sm:$0xff] %v223_v49 }
 0x1a2   :  { %235 = dma.vmem_to_hbm [thread:$0]  %s231_s2, 128, %s233_s26, [#allocation4]  }
 0x1a3   :  { %381 = dma.done.wait [#allocation4], 128  }
 0x1a4   :  { %382 = vsyncadd [#allocation4], 4294967168 }
 0x1a5   :  { %240 = vsyncpa [#allocation3], 1 }
 0x1a6   :  { %241 = vsyncpa [#allocation4], 1 }

</bundles_post_ra>
